<compile_context>
chip_gen: v6e
topology: v6e:2x2x1
jax: 0.10.0
libtpu: 0.0.40
codegen_flags: <defaults>
</compile_context>

<pallas_src>
import functools

import jax
import jax.numpy as jnp
from jax.experimental import pallas as pl
from jax.experimental.pallas import tpu as pltpu


def _conv_kernel(x_ref, w_ref, b_ref, o_ref, *, k, Wp, HWf):
    """One grid step == one image.

    x_ref : (1, C, L)      zero-padded image, spatial flattened (L = Hp_ext*Wp)
    w_ref : (k*k, O, C)    all tap weights, resident in VMEM
    b_ref : (O, 1)         bias, resident in VMEM
    o_ref : (1, O, HWf)    stride-1 output at padded width (HWf = H*Wp)
    """
    acc = None
    t = 0
    for kh in range(k):          # static unrolled tap loop (k*k small matmuls,
        for kw in range(k):      # lane-dense N = HWf, accumulated in registers)
            s = kh * Wp + kw                      # static flat shift of this tap
            x_s = x_ref[0, :, s:s + HWf]          # (C, HWf)
            d = jnp.dot(w_ref[t], x_s, preferred_element_type=jnp.float32)
            acc = d if acc is None else acc + d
            t += 1
    o_ref[0] = (acc + b_ref[...]).astype(o_ref.dtype)


def conv2d_pallas(x_nchw, weight_oikk, bias_o, stride=1):
    """Conv2d with padding = kernel_size // 2 (matches the PyTorch module)."""
    N, C, H, W = x_nchw.shape
    O, C2, k, _ = weight_oikk.shape
    assert C == C2
    p = k // 2

    Wp = W + 2 * p                       # padded width
    extra = 1 if p > 0 else 0            # 1 extra zero row so the largest tap
    Hp_ext = H + 2 * p + extra           # shift stays in bounds of the flat buf
    L = Hp_ext * Wp
    HWf = H * Wp                         # stride-1 output rows at padded width
    T = k * k

    # ---- glue: pad (NCHW is already the layout we want), flatten spatial ----
    x_pad = jnp.pad(x_nchw, ((0, 0), (0, 0), (p, p + extra), (p, p)))
    x_flat = x_pad.reshape(N, C, L)

    # weight (O, C, k, k) -> (T, O, C), tap index t = kh*k + kw
    w_taps = jnp.transpose(weight_oikk, (2, 3, 0, 1)).reshape(T, O, C)
    b2d = bias_o.reshape(O, 1).astype(jnp.float32)

    kernel = functools.partial(_conv_kernel, k=k, Wp=Wp, HWf=HWf)

    out_flat = pl.pallas_call(
        kernel,
        out_shape=jax.ShapeDtypeStruct((N, O, HWf), x_nchw.dtype),
        grid_spec=pltpu.PrefetchScalarGridSpec(
            num_scalar_prefetch=0,
            grid=(N,),
            in_specs=[
                pl.BlockSpec((1, C, L), lambda n: (n, 0, 0)),   # one image
                pl.BlockSpec((T, O, C), lambda n: (0, 0, 0)),   # resident weights
                pl.BlockSpec((O, 1), lambda n: (0, 0)),         # resident bias
            ],
            out_specs=pl.BlockSpec((1, O, HWf), lambda n: (n, 0, 0)),
        ),
        compiler_params=pltpu.CompilerParams(
            dimension_semantics=("parallel",)
        ),
    )(x_flat, w_taps, b2d)

    # (N, O, H*Wp) -> (N, O, H, Wp); drop the junk columns from the flat wrap.
    out = out_flat.reshape(N, O, H, Wp)[:, :, :, :W]
    if stride > 1:
        # stride>1: subsample the stride-1 result (valid for odd k, pad=k//2).
        out = out[:, :, ::stride, ::stride]
    return out


if __name__ == "__main__":
    # Module config (defaults: BN=False, act=None, stride=1, bias=True)
    in_channel, out_channel, kernel_size, stride = 4, 8, 3, 1
    N, H, W = 2, 16, 16

    key = jax.random.PRNGKey(0)
    kx, kw = jax.random.split(key)
    x = jax.random.normal(kx, (N, in_channel, H, W), dtype=jnp.float32)
    # _conv init: weight ~ N(0, 0.02), bias = zeros
    weight = 0.02 * jax.random.normal(
        kw, (out_channel, in_channel, kernel_size, kernel_size), dtype=jnp.float32
    )
    bias = jnp.zeros((out_channel,), dtype=jnp.float32)

    out = conv2d_pallas(x, weight, bias, stride=stride)
    out = jax.block_until_ready(out)

    # Cross-check against XLA's conv (reference), same NCHW/OIHW convention.
    ref = jax.lax.conv_general_dilated(
        x, weight, window_strides=(stride, stride),
        padding=[(kernel_size // 2, kernel_size // 2)] * 2,
        dimension_numbers=("NCHW", "OIHW", "NCHW"),
    ) + bias.reshape(1, -1, 1, 1)
    assert out.shape == (N, out_channel, H, W)
    assert jnp.allclose(out, ref, atol=1e-5, rtol=1e-5)

    print("KERNEL_OK")
</pallas_src>

<mosaic_0001>
module attributes {stable_mosaic.version = 11 : i64} {
  func.func @_conv_kernel(%arg0: i32, %arg1: memref<1x4x342xf32, #tpu.memory_space<vmem>>, %arg2: memref<9x8x4xf32, #tpu.memory_space<vmem>>, %arg3: memref<8x1xf32, #tpu.memory_space<vmem>>, %arg4: memref<1x8x288xf32, #tpu.memory_space<vmem>>) attributes {dimension_semantics = [#tpu.dimension_semantics<parallel>], iteration_bounds = array<i64: 2>, scalar_prefetch = 0 : i64, scratch_operands = 0 : i64, tpu.core_type = #tpu.core_type<tc>, window_params = [{transform_indices = @transform_0, window_bounds = array<i64: 1, 4, 342>}, {pipeline_mode = #tpu.pipeline_mode<synchronous>, transform_indices = @transform_1, window_bounds = array<i64: 9, 8, 4>}, {pipeline_mode = #tpu.pipeline_mode<synchronous>, transform_indices = @transform_2, window_bounds = array<i64: 8, 1>}, {transform_indices = @transform_3, window_bounds = array<i64: 1, 8, 288>}]} {
    %c0 = arith.constant 0 : index
    %c0_0 = arith.constant 0 : index
    %c0_1 = arith.constant 0 : index
    %0 = vector.load %arg1[%c0, %c0_0, %c0_1] : memref<1x4x342xf32, #tpu.memory_space<vmem>>, vector<1x4x288xf32>
    %1 = vector.shape_cast %0 : vector<1x4x288xf32> to vector<4x288xf32>
    %c0_2 = arith.constant 0 : index
    %c0_3 = arith.constant 0 : index
    %c0_4 = arith.constant 0 : index
    %2 = vector.load %arg2[%c0_2, %c0_3, %c0_4] : memref<9x8x4xf32, #tpu.memory_space<vmem>>, vector<1x8x4xf32>
    %3 = vector.shape_cast %2 : vector<1x8x4xf32> to vector<8x4xf32>
    %cst = arith.constant dense<0.000000e+00> : vector<8x288xf32>
    %4 = tpu.matmul %3, %1, %cst {dimension_numbers = #tpu.dot_dimension_numbers<[1], [0], [0], [1], [0, 0, 1, 1], [], []>} : vector<8x4xf32>, vector<4x288xf32>, vector<8x288xf32> -> vector<8x288xf32>
    %c0_5 = arith.constant 0 : index
    %c0_6 = arith.constant 0 : index
    %c1 = arith.constant 1 : index
    %5 = vector.load %arg1[%c0_5, %c0_6, %c1] : memref<1x4x342xf32, #tpu.memory_space<vmem>>, vector<1x4x288xf32>
    %6 = vector.shape_cast %5 : vector<1x4x288xf32> to vector<4x288xf32>
    %c1_7 = arith.constant 1 : index
    %c0_8 = arith.constant 0 : index
    %c0_9 = arith.constant 0 : index
    %7 = vector.load %arg2[%c1_7, %c0_8, %c0_9] : memref<9x8x4xf32, #tpu.memory_space<vmem>>, vector<1x8x4xf32>
    %8 = vector.shape_cast %7 : vector<1x8x4xf32> to vector<8x4xf32>
    %cst_10 = arith.constant dense<0.000000e+00> : vector<8x288xf32>
    %9 = tpu.matmul %8, %6, %cst_10 {dimension_numbers = #tpu.dot_dimension_numbers<[1], [0], [0], [1], [0, 0, 1, 1], [], []>} : vector<8x4xf32>, vector<4x288xf32>, vector<8x288xf32> -> vector<8x288xf32>
    %10 = arith.addf %4, %9 : vector<8x288xf32>
    %c0_11 = arith.constant 0 : index
    %c0_12 = arith.constant 0 : index
    %c2 = arith.constant 2 : index
    %11 = vector.load %arg1[%c0_11, %c0_12, %c2] : memref<1x4x342xf32, #tpu.memory_space<vmem>>, vector<1x4x288xf32>
    %12 = vector.shape_cast %11 : vector<1x4x288xf32> to vector<4x288xf32>
    %c2_13 = arith.constant 2 : index
    %c0_14 = arith.constant 0 : index
    %c0_15 = arith.constant 0 : index
    %13 = vector.load %arg2[%c2_13, %c0_14, %c0_15] : memref<9x8x4xf32, #tpu.memory_space<vmem>>, vector<1x8x4xf32>
    %14 = vector.shape_cast %13 : vector<1x8x4xf32> to vector<8x4xf32>
    %cst_16 = arith.constant dense<0.000000e+00> : vector<8x288xf32>
    %15 = tpu.matmul %14, %12, %cst_16 {dimension_numbers = #tpu.dot_dimension_numbers<[1], [0], [0], [1], [0, 0, 1, 1], [], []>} : vector<8x4xf32>, vector<4x288xf32>, vector<8x288xf32> -> vector<8x288xf32>
    %16 = arith.addf %10, %15 : vector<8x288xf32>
    %c0_17 = arith.constant 0 : index
    %c0_18 = arith.constant 0 : index
    %c18 = arith.constant 18 : index
    %17 = vector.load %arg1[%c0_17, %c0_18, %c18] : memref<1x4x342xf32, #tpu.memory_space<vmem>>, vector<1x4x288xf32>
    %18 = vector.shape_cast %17 : vector<1x4x288xf32> to vector<4x288xf32>
    %c3 = arith.constant 3 : index
    %c0_19 = arith.constant 0 : index
    %c0_20 = arith.constant 0 : index
    %19 = vector.load %arg2[%c3, %c0_19, %c0_20] : memref<9x8x4xf32, #tpu.memory_space<vmem>>, vector<1x8x4xf32>
    %20 = vector.shape_cast %19 : vector<1x8x4xf32> to vector<8x4xf32>
    %cst_21 = arith.constant dense<0.000000e+00> : vector<8x288xf32>
    %21 = tpu.matmul %20, %18, %cst_21 {dimension_numbers = #tpu.dot_dimension_numbers<[1], [0], [0], [1], [0, 0, 1, 1], [], []>} : vector<8x4xf32>, vector<4x288xf32>, vector<8x288xf32> -> vector<8x288xf32>
    %22 = arith.addf %16, %21 : vector<8x288xf32>
    %c0_22 = arith.constant 0 : index
    %c0_23 = arith.constant 0 : index
    %c19 = arith.constant 19 : index
    %23 = vector.load %arg1[%c0_22, %c0_23, %c19] : memref<1x4x342xf32, #tpu.memory_space<vmem>>, vector<1x4x288xf32>
    %24 = vector.shape_cast %23 : vector<1x4x288xf32> to vector<4x288xf32>
    %c4 = arith.constant 4 : index
    %c0_24 = arith.constant 0 : index
    %c0_25 = arith.constant 0 : index
    %25 = vector.load %arg2[%c4, %c0_24, %c0_25] : memref<9x8x4xf32, #tpu.memory_space<vmem>>, vector<1x8x4xf32>
    %26 = vector.shape_cast %25 : vector<1x8x4xf32> to vector<8x4xf32>
    %cst_26 = arith.constant dense<0.000000e+00> : vector<8x288xf32>
    %27 = tpu.matmul %26, %24, %cst_26 {dimension_numbers = #tpu.dot_dimension_numbers<[1], [0], [0], [1], [0, 0, 1, 1], [], []>} : vector<8x4xf32>, vector<4x288xf32>, vector<8x288xf32> -> vector<8x288xf32>
    %28 = arith.addf %22, %27 : vector<8x288xf32>
    %c0_27 = arith.constant 0 : index
    %c0_28 = arith.constant 0 : index
    %c20 = arith.constant 20 : index
    %29 = vector.load %arg1[%c0_27, %c0_28, %c20] : memref<1x4x342xf32, #tpu.memory_space<vmem>>, vector<1x4x288xf32>
    %30 = vector.shape_cast %29 : vector<1x4x288xf32> to vector<4x288xf32>
    %c5 = arith.constant 5 : index
    %c0_29 = arith.constant 0 : index
    %c0_30 = arith.constant 0 : index
    %31 = vector.load %arg2[%c5, %c0_29, %c0_30] : memref<9x8x4xf32, #tpu.memory_space<vmem>>, vector<1x8x4xf32>
    %32 = vector.shape_cast %31 : vector<1x8x4xf32> to vector<8x4xf32>
    %cst_31 = arith.constant dense<0.000000e+00> : vector<8x288xf32>
    %33 = tpu.matmul %32, %30, %cst_31 {dimension_numbers = #tpu.dot_dimension_numbers<[1], [0], [0], [1], [0, 0, 1, 1], [], []>} : vector<8x4xf32>, vector<4x288xf32>, vector<8x288xf32> -> vector<8x288xf32>
    %34 = arith.addf %28, %33 : vector<8x288xf32>
    %c0_32 = arith.constant 0 : index
    %c0_33 = arith.constant 0 : index
    %c36 = arith.constant 36 : index
    %35 = vector.load %arg1[%c0_32, %c0_33, %c36] : memref<1x4x342xf32, #tpu.memory_space<vmem>>, vector<1x4x288xf32>
    %36 = vector.shape_cast %35 : vector<1x4x288xf32> to vector<4x288xf32>
    %c6 = arith.constant 6 : index
    %c0_34 = arith.constant 0 : index
    %c0_35 = arith.constant 0 : index
    %37 = vector.load %arg2[%c6, %c0_34, %c0_35] : memref<9x8x4xf32, #tpu.memory_space<vmem>>, vector<1x8x4xf32>
    %38 = vector.shape_cast %37 : vector<1x8x4xf32> to vector<8x4xf32>
    %cst_36 = arith.constant dense<0.000000e+00> : vector<8x288xf32>
    %39 = tpu.matmul %38, %36, %cst_36 {dimension_numbers = #tpu.dot_dimension_numbers<[1], [0], [0], [1], [0, 0, 1, 1], [], []>} : vector<8x4xf32>, vector<4x288xf32>, vector<8x288xf32> -> vector<8x288xf32>
    %40 = arith.addf %34, %39 : vector<8x288xf32>
    %c0_37 = arith.constant 0 : index
    %c0_38 = arith.constant 0 : index
    %c37 = arith.constant 37 : index
    %41 = vector.load %arg1[%c0_37, %c0_38, %c37] : memref<1x4x342xf32, #tpu.memory_space<vmem>>, vector<1x4x288xf32>
    %42 = vector.shape_cast %41 : vector<1x4x288xf32> to vector<4x288xf32>
    %c7 = arith.constant 7 : index
    %c0_39 = arith.constant 0 : index
    %c0_40 = arith.constant 0 : index
    %43 = vector.load %arg2[%c7, %c0_39, %c0_40] : memref<9x8x4xf32, #tpu.memory_space<vmem>>, vector<1x8x4xf32>
    %44 = vector.shape_cast %43 : vector<1x8x4xf32> to vector<8x4xf32>
    %cst_41 = arith.constant dense<0.000000e+00> : vector<8x288xf32>
    %45 = tpu.matmul %44, %42, %cst_41 {dimension_numbers = #tpu.dot_dimension_numbers<[1], [0], [0], [1], [0, 0, 1, 1], [], []>} : vector<8x4xf32>, vector<4x288xf32>, vector<8x288xf32> -> vector<8x288xf32>
    %46 = arith.addf %40, %45 : vector<8x288xf32>
    %c0_42 = arith.constant 0 : index
    %c0_43 = arith.constant 0 : index
    %c38 = arith.constant 38 : index
    %47 = vector.load %arg1[%c0_42, %c0_43, %c38] : memref<1x4x342xf32, #tpu.memory_space<vmem>>, vector<1x4x288xf32>
    %48 = vector.shape_cast %47 : vector<1x4x288xf32> to vector<4x288xf32>
    %c8 = arith.constant 8 : index
    %c0_44 = arith.constant 0 : index
    %c0_45 = arith.constant 0 : index
    %49 = vector.load %arg2[%c8, %c0_44, %c0_45] : memref<9x8x4xf32, #tpu.memory_space<vmem>>, vector<1x8x4xf32>
    %50 = vector.shape_cast %49 : vector<1x8x4xf32> to vector<8x4xf32>
    %cst_46 = arith.constant dense<0.000000e+00> : vector<8x288xf32>
    %51 = tpu.matmul %50, %48, %cst_46 {dimension_numbers = #tpu.dot_dimension_numbers<[1], [0], [0], [1], [0, 0, 1, 1], [], []>} : vector<8x4xf32>, vector<4x288xf32>, vector<8x288xf32> -> vector<8x288xf32>
    %52 = arith.addf %46, %51 : vector<8x288xf32>
    %c0_47 = arith.constant 0 : index
    %c0_48 = arith.constant 0 : index
    %53 = vector.load %arg3[%c0_47, %c0_48] : memref<8x1xf32, #tpu.memory_space<vmem>>, vector<8x1xf32>
    %54 = vector.broadcast %53 : vector<8x1xf32> to vector<8x288xf32>
    %55 = arith.addf %52, %54 : vector<8x288xf32>
    %c0_49 = arith.constant 0 : index
    %c0_50 = arith.constant 0 : index
    %c0_51 = arith.constant 0 : index
    %56 = vector.load %arg4[%c0_49, %c0_50, %c0_51] : memref<1x8x288xf32, #tpu.memory_space<vmem>>, vector<1x8x288xf32>
    %57 = vector.shape_cast %56 : vector<1x8x288xf32> to vector<8x288xf32>
    %58 = vector.shape_cast %55 : vector<8x288xf32> to vector<1x8x288xf32>
    tpu.vector_store %arg4[%c0_49, %c0_50, %c0_51], %58 {strides = array<i32>} : memref<1x8x288xf32, #tpu.memory_space<vmem>>, vector<1x8x288xf32>,
    return
  }
  func.func @transform_0(%arg0: i32) -> (i32, i32, i32) {
    %c0_i32 = arith.constant 0 : i32
    %c0_i32_0 = arith.constant 0 : i32
    %c0_i32_1 = arith.constant 0 : i32
    return %arg0, %c0_i32, %c0_i32_0 : i32, i32, i32
  }
  func.func @transform_1(%arg0: i32) -> (i32, i32, i32) {
    %c0_i32 = arith.constant 0 : i32
    %c0_i32_0 = arith.constant 0 : i32
    %c0_i32_1 = arith.constant 0 : i32
    %c0_i32_2 = arith.constant 0 : i32
    return %c0_i32, %c0_i32_0, %c0_i32_1 : i32, i32, i32
  }
  func.func @transform_2(%arg0: i32) -> (i32, i32) {
    %c0_i32 = arith.constant 0 : i32
    %c0_i32_0 = arith.constant 0 : i32
    %c0_i32_1 = arith.constant 0 : i32
    return %c0_i32, %c0_i32_0 : i32, i32
  }
  func.func @transform_3(%arg0: i32) -> (i32, i32, i32) {
    %c0_i32 = arith.constant 0 : i32
    %c0_i32_0 = arith.constant 0 : i32
    %c0_i32_1 = arith.constant 0 : i32
    return %arg0, %c0_i32, %c0_i32_0 : i32, i32, i32
  }
}

</mosaic_0001>

<bundles_post_ra>
// kernel: tpu_custom_call.1
= control target key start
LH: loop header
LB: loop body
LE: loop exit
PB: predicated region body
PF: predicated region fallthrough
CT: control target
= control target key end

     0   :  { %8 = vsyncpa [#allocation3], 0  ;;  %s2274_s0 = inlined_call_operand.vmem [shape: f32[2,4,342], index: 0, kind: input, shape index: {}]   ;;  %s2275_s1 = inlined_call_operand.vmem [shape: f32[9,8,4], index: 1, kind: input, shape index: {}]   ;;  %s2276_s2 = inlined_call_operand.vmem [shape: f32[8,1], index: 2, kind: input, shape index: {}]   ;;  %s2277_s3 = inlined_call_operand.hbm [shape: f32[2,8,288], index: 3, kind: output, shape index: {}]  }
   0x1   :  { %10 = vsyncpa [#allocation3 + $0x1], 0  ;;  %s2031_s12 = smov 0   ;;  %s2033_s13 = smov 0  }
   0x2   :  { %s2035_s14 = smov 0   ;;  %s2037_s15 = smov 0  }
   0x3 LB: > { %s2052_s16 = sadd.s32 4294967295, %s1997_s15   ;;  %s1758_s17 = sadd.s32 4294967294, %s1997_s15   ;;  %s1997_s15 = sphi %s2037_s15, %s2283_s15   ;;  %s1993_s14 = sphi %s2035_s14, %s2282_s14   ;;  %s1989_s13 = sphi %s2033_s13, %s2281_s13   ;;  %s1985_s12 = sphi %s2031_s12, %s2280_s12  }
   0x4   : > { %s2056_s18 = sadd.s32 1, %s1997_s15   ;;  %s91_s19 = sadd.s32 1, %s1993_s14 }
   0x5   : > { %s88_s20 = ssub.s32 %s1997_s15, %s2056_s18  ;;  %p101_p0 = scmp.ne.s32.totalorder %s1993_s14, %s1989_s13 }
   0x6   : > { %p89_p1 = scmp.eq.s32.totalorder %s88_s20, 0  ;;  %p102_p2 = scmp.eq.s32.totalorder %s2052_s16, 1 }
   0x7   : > { %p107_p3 = scmp.ne.s32.totalorder %s1989_s13, %s1985_s12  ;;  %p108_p4 = scmp.eq.s32.totalorder %s1758_s17, 1 }
   0x8   : > { %s2067_s21 = scalar_select %p89_p1, %s1993_s14, %s91_s19  }
   0x9   : > { %p2069_p5 = por %p102_p2, %p101_p0  ;;  %p2073_p6 = por %p108_p4, %p107_p3 }
   0xa   : > { %p1761_p7 = scmp.ge.s32.totalorder %s1997_s15, 1  ;;  %p140_p8 = scmp.lt.s32.totalorder %s1997_s15, 3 }
   0xc   : > { %p141_p9 = pnand %p1761_p7, %p140_p8 }
   0xd   : > { %p164_p10 = scmp.lt.s32.totalorder (!%p141_p9), %s2052_s16, 1  ;;  %s2001_s29 = smov (!%p141_p9), 127  }
   0xe   : > { %144 = sbr.rel (%p141_p9) target bundleno = 399 (0x18f), region = 32  ;;  %s2002_s30 = smov (!%p141_p9), 126  }
   0xf   : > { %s2003_s4 = smov (!%p141_p9), 110   ;;  %s2004_s5 = smov (!%p141_p9), 109  }
  0x10   : > { %s2005_s6 = smov (!%p141_p9), 108   ;;  %s2006_s7 = smov (!%p141_p9), 92  }
  0x11   : > { %s2008_s8 = smov (!%p141_p9), 91   ;;  %s2009_s9 = smov (!%p141_p9), 90  }
  0x12   : > { %s161_s17 = sand.u32 (!%p141_p9), 1, %s1989_s13   ;;  %s1884_s20 = smul.u32 (!%p141_p9), 384, %s2052_s16 }
  0x13   : > { %v1999_v0 = vmov 0.0   ;;  %vm2000_vm0 = vmmov 0   ;;  %s165_s24 = scalar_select %p164_p10, %s2052_s16, 1  ;;  %v2007_v10 = vmov 0   ;;  %v1671_v12 = vld [vmem:[%s2276_s2] sm:$0xff]  ;;  %vm190_vm1 = vcmask 1043456  }
  0x14   : > { %1837 = vmatprep.subr.mxu1 %v1999_v0  ;;  %1839 = vmatprep.mubr.msk.f32.mxu1 %vm2000_vm0, %v1999_v0  ;;  %v1763_v13 = vld [vmem:[%s2275_s1 + $0x8] sm:$0xff]  ;;  %vm186_vm2 = vcmask 31744   ;;  %v171_v16 = vld [vmem:[%s2275_s1] sm:$0xff]  ;;  %vm183_vm3 = vcmask 1039360   ;;  %v1774_v19 = vld [vmem:[%s2275_s1 + $0x10] sm:$0xff]  ;;  %vm501_vm4 = vcmask 1031168  }
  0x15   : > { %261 = vmatprep.mubr.f32.mxu0 %v1999_v0  ;;  %s1883_s25 = smul.u32 12, %s165_s24  ;;  %1935 = vset.pattern.permute.xlu0 %v2007_v10  ;;  %v1780_v26 = vld [vmem:[%s2275_s1 + $0x18] sm:$0xff]  ;;  %vm670_vm5 = vcmask 900096   ;;  %vm839_vm6 = vcmask 891904   ;;  %v1786_v35 = vld [vmem:[%s2275_s1 + $0x20] sm:$0xff]  ;;  %vm1008_vm7 = vcmask 883712  }
  0x16   : > { %v1792_v40 = vld [vmem:[%s2275_s1 + $0x28] sm:$0xff]  ;;  %vm1177_vm8 = vcmask 752640   ;;  %v1798_v45 = vld [vmem:[%s2275_s1 + $0x30] sm:$0xff]  ;;  %vm1346_vm9 = vcmask 744448   ;;  %v1804_v50 = vld [vmem:[%s2275_s1 + $0x38] sm:$0xff]  ;;  %vm1515_vm10 = vcmask 736256  }
  0x17   : > { %s2088_s28 = scalar_lea.vmem %s2274_s0, %s1883_s25  ;;  %v1810_v57 = vld [vmem:[%s2275_s1 + $0x40] sm:$0xff]  ;;  %s1882_s19 = smul.u32 24, %s161_s17  ;;  %vm1682_vm11 = vcmask 261120  }
  0x18   : > { %v170_v1 = vld [vmem:[%s2088_s28 + $0x8] sm:$0xf]  ;;  %v2092_v2 = vld [vmem:[%s2088_s28] sm:$0xff]  ;;  %s2010_s16 = smov [#allocation2]  }
  0x19   : > { %181 = vrot.lane.b32.xlu0 %v170_v1, %s2001_s29  ;;  %177 = vrot.lane.b32.xlu1 %v2092_v2, %s2001_s29  ;;  %v489_v3 = vld [vmem:[%s2088_s28 + $0x8] sm:$0xf]  ;;  %v2098_v4 = vcombine.high %v2092_v2, %v2092_v2  ;;  %s163_s24 = scalar_lea.vmem [#allocation2], %s1882_s19 }
  0x1a   : > { %v658_v5 = vld [vmem:[%s2088_s28 + $0x8] sm:$0xf]  ;;  %s1699_s25 = sshll.u32 %s163_s24, 4  ;;  %s1700_s25 = int_to_ptr.vmem [resolvable:$true] %s1699_s25 }
  0x1b   : > { %v827_v6 = vld [vmem:[%s2088_s28 + $0x8] sm:$0xf] }
  0x1c   : > { %v996_v7 = vld [vmem:[%s2088_s28 + $0x8] sm:$0xf] }
  0x1d   : > { %499 = vrot.lane.b32.xlu0 %v489_v3, %s2002_s30  ;;  %495 = vrot.lane.b32.xlu1 %v2092_v2, %s2002_s30  ;;  %v1165_v8 = vld [vmem:[%s2088_s28 + $0x8] sm:$0xf] }
  0x1e   : > { %v1334_v9 = vld [vmem:[%s2088_s28 + $0x8] sm:$0xf] }
  0x1f   : > { %v1503_v11 = vld [vmem:[%s2088_s28 + $0x8] sm:$0xf]  ;;  %s1697_s28 = scalar_lea.hbm %s2277_s3, %s1884_s20 }
  0x21   : > { %497 = vrot.lane.b32.xlu1 %v2098_v4, %s2002_s30  ;;  %179 = vrot.lane.b32.xlu0 %v2098_v4, %s2001_s29  ;;  %s1685_s29 = scalar_lea.sflag [#allocation3], %s161_s17  ;;  %s1937_s30 = scalar_lea.vmem %s1700_s25, 384 }
  0x22   : > { %p1938_p11 = scmp.ne.s32.totalorder %s1700_s25, %s1937_s30 }
  0x24   : > { %p1939_p12 = pnand %p1938_p11, %p2069_p5 }
  0x25   : > { %668 = vrot.lane.b32.xlu1 %v658_v5, %s2003_s4  ;;  %666 = vrot.lane.b32.xlu0 %v2098_v4, %s2003_s4 }
  0x26   : > { %p1940_p13 = pneg %p1939_p12 }
  0x29   : > { %835 = vrot.lane.b32.xlu1 %v2098_v4, %s2004_s5  ;;  %664 = vrot.lane.b32.xlu0 %v2092_v2, %s2003_s4  ;;  %s1941_s4 = sshll.u32 %s2010_s16, 4  ;;  %s1942_s4 = int_to_ptr.vmem [resolvable:$false] %s1941_s4 }
  0x2a   : > { %p1944_p0 = scmp.lt.s32.totalorder %s1700_s25, %s1942_s4 }
  0x2d   : > { %833 = vrot.lane.b32.xlu1 %v2092_v2, %s2004_s5  ;;  %837 = vrot.lane.b32.xlu0 %v827_v6, %s2004_s5  ;;  %s1943_s5 = scalar_lea.vmem %s1942_s4, 768 }
  0x2e   : > { %p1945_p1 = scmp.lt.s32.totalorder %s1943_s5, %s1937_s30 }
  0x30   : > { %p1946_p2 = por %p1945_p1, %p1944_p0 }
  0x31   : > { %1006 = vrot.lane.b32.xlu1 %v996_v7, %s2005_s6  ;;  %1004 = vrot.lane.b32.xlu0 %v2098_v4, %s2005_s6 }
  0x32   : > { %p1947_p3 = pnand %p1946_p2, %p1940_p13 }
  0x35   : > { %1173 = vrot.lane.b32.xlu1 %v2098_v4, %s2006_s7  ;;  %1002 = vrot.lane.b32.xlu0 %v2092_v2, %s2005_s6 }
  0x39   : > { %1171 = vrot.lane.b32.xlu1 %v2092_v2, %s2006_s7  ;;  %1175 = vrot.lane.b32.xlu0 %v1165_v8, %s2006_s7 }
  0x3d   : > { %1344 = vrot.lane.b32.xlu1 %v1334_v9, %s2008_s8  ;;  %1342 = vrot.lane.b32.xlu0 %v2098_v4, %s2008_s8 }
  0x41   : > { %1511 = vrot.lane.b32.xlu1 %v2098_v4, %s2009_s9  ;;  %1340 = vrot.lane.b32.xlu0 %v2092_v2, %s2008_s8 }
  0x45   : > { %1509 = vrot.lane.b32.xlu1 %v2092_v2, %s2009_s9  ;;  %1513 = vrot.lane.b32.xlu0 %v1503_v11, %s2009_s9 }
  0x49   : > { %1674 = vperm.xlu0 %1935, %v1671_v12  }
  0x8b   : > { %v182_v14 = vpop.permute.xlu0 %181  ;;  %v178_v15 = vpop.permute.xlu1 %177 }
  0x8c   : > { %1838 = vmatpush3.msk.msra.mxu1 %vm190_vm1, %v182_v14 }
  0x8d   : > { %1840 = vmatmul.mubr.msk.f32.vlgmr.msra.gmra.mxu1 %vm186_vm2, %v1763_v13  ;;  %1842 = vmatprep.subr.mxu1 %v1999_v0 }
  0x8e   : > { %1843 = vmatpush3.msk.msra.mxu1 %vm190_vm1, %v170_v1  ;;  %1844 = vmatprep.mubr.msk.f32.mxu1 %vm2000_vm0, %v1999_v0 }
  0x8f   : > { %v500_v17 = vpop.permute.xlu0 %499  ;;  %v496_v18 = vpop.permute.xlu1 %495  ;;  %1847 = vmatprep.subr.mxu1 %v1999_v0 }
  0x91   : > { %1845 = vmatmul.mubr.msk.f32.vlgmr.msra.gmra.mxu1 %vm186_vm2, %v171_v16 }
  0x92   : > { %1848 = vmatpush3.msk.msra.mxu1 %vm190_vm1, %v500_v17  ;;  %1849 = vmatprep.mubr.msk.f32.mxu1 %vm2000_vm0, %v1999_v0 }
  0x93   : > { %v498_v20 = vpop.permute.xlu1 %497  ;;  %v180_v21 = vpop.permute.xlu0 %179  ;;  %1852 = vmatprep.subr.mxu1 %v1999_v0 }
  0x94   : > { %v185_v22 = vsel %vm183_vm3, %v180_v21, %v182_v14  ;;  %v184_v23 = vsel %vm183_vm3, %v178_v15, %v180_v21  ;;  %v503_v27 = vsel %vm501_vm4, %v498_v20, %v500_v17  ;;  %v502_v28 = vsel %vm501_vm4, %v496_v18, %v498_v20 }
  0x95   : > { %1764 = vmatprep.subr.msk.mxu0 %vm190_vm1, %v185_v22  ;;  %1850 = vmatmul.mubr.msk.f32.vlgmr.msra.gmra.mxu1 %vm186_vm2, %v1774_v19 }
  0x96   : > { %1765 = vmatpush1.msk.msra.mxu0 %vm190_vm1, %v184_v23  ;;  %1854 = vmatprep.mubr.msk.f32.mxu1 %vm2000_vm0, %v1999_v0 }
  0x97   : > { %v669_v24 = vpop.permute.xlu1 %668  ;;  %1766 = vmatmul.mubr.msk.f32.vlgmr.msra.gmra.mxu0 %vm186_vm2, %v1763_v13  ;;  %1769 = vmatprep.subr.msk.mxu0 %vm190_vm1, %v2098_v4  ;;  %v667_v25 = vpop.permute.xlu0 %666 }
  0x98   : > { %1770 = vmatpush1.msk.msra.mxu0 %vm190_vm1, %v2092_v2  ;;  %1853 = vmatpush3.msk.msra.mxu1 %vm190_vm1, %v669_v24  ;;  %v672_v31 = vsel %vm670_vm5, %v667_v25, %v669_v24 }
  0x99   : > { %1775 = vmatprep.subr.msk.mxu0 %vm190_vm1, %v503_v27  ;;  %411 = vmatprep.mubr.f32.mxu0 %v1999_v0 }
  0x9a   : > { %1857 = vmatprep.subr.mxu1 %v1999_v0  ;;  %1855 = vmatmul.mubr.msk.f32.vlgmr.msra.gmra.mxu1 %vm186_vm2, %v1780_v26 }
  0x9b   : > { %v836_v29 = vpop.permute.xlu1 %835  ;;  %1771 = vmatmul.mubr.msk.f32.vlgmr.msra.gmra.mxu0 %vm186_vm2, %v171_v16  ;;  %v665_v30 = vpop.permute.xlu0 %664  ;;  %1859 = vmatprep.mubr.msk.f32.mxu1 %vm2000_vm0, %v1999_v0 }
  0x9c   : > { %1776 = vmatpush1.msk.msra.mxu0 %vm190_vm1, %v502_v28  ;;  %577 = vmatprep.mubr.f32.mxu0 %v1999_v0  ;;  %v671_v32 = vsel %vm670_vm5, %v665_v30, %v667_v25 }
  0x9d   : > { %1781 = vmatprep.subr.msk.mxu0 %vm190_vm1, %v672_v31 }
  0x9f   : > { %v834_v33 = vpop.permute.xlu1 %833  ;;  %1777 = vmatmul.mubr.msk.f32.vlgmr.msra.gmra.mxu0 %vm186_vm2, %v1774_v19  ;;  %v838_v34 = vpop.permute.xlu0 %837 }
  0xa0   : > { %1782 = vmatpush1.msk.msra.mxu0 %vm190_vm1, %v671_v32  ;;  %v841_v36 = vsel %vm839_vm6, %v836_v29, %v838_v34  ;;  %1858 = vmatpush3.msk.msra.mxu1 %vm190_vm1, %v838_v34  ;;  %v840_v37 = vsel %vm839_vm6, %v834_v33, %v836_v29 }
  0xa1   : > { %1787 = vmatprep.subr.msk.mxu0 %vm190_vm1, %v841_v36  ;;  %746 = vmatprep.mubr.f32.mxu0 %v1999_v0 }
  0xa2   : > { %1860 = vmatmul.mubr.msk.f32.vlgmr.msra.gmra.mxu1 %vm186_vm2, %v1786_v35  ;;  %1862 = vmatprep.subr.mxu1 %v1999_v0 }
  0xa3   : > { %v1007_v38 = vpop.permute.xlu1 %1006  ;;  %1783 = vmatmul.mubr.msk.f32.vlgmr.msra.gmra.mxu0 %vm186_vm2, %v1780_v26  ;;  %v1005_v39 = vpop.permute.xlu0 %1004  ;;  %1864 = vmatprep.mubr.msk.f32.mxu1 %vm2000_vm0, %v1999_v0 }
  0xa4   : > { %1788 = vmatpush1.msk.msra.mxu0 %vm190_vm1, %v840_v37  ;;  %v1010_v41 = vsel %vm1008_vm7, %v1005_v39, %v1007_v38  ;;  %1863 = vmatpush3.msk.msra.mxu1 %vm190_vm1, %v1007_v38 }
  0xa5   : > { %1793 = vmatprep.subr.msk.mxu0 %vm190_vm1, %v1010_v41  ;;  %915 = vmatprep.mubr.f32.mxu0 %v1999_v0 }
  0xa6   : > { %1865 = vmatmul.mubr.msk.f32.vlgmr.msra.gmra.mxu1 %vm186_vm2, %v1792_v40  ;;  %1867 = vmatprep.subr.mxu1 %v1999_v0 }
  0xa7   : > { %v1174_v42 = vpop.permute.xlu1 %1173  ;;  %1789 = vmatmul.mubr.msk.f32.vlgmr.msra.gmra.mxu0 %vm186_vm2, %v1786_v35  ;;  %v1003_v43 = vpop.permute.xlu0 %1002  ;;  %1869 = vmatprep.mubr.msk.f32.mxu1 %vm2000_vm0, %v1999_v0 }
  0xa8   : > { %v1009_v44 = vsel %vm1008_vm7, %v1003_v43, %v1005_v39  ;;  %1084 = vmatprep.mubr.f32.mxu0 %v1999_v0 }
  0xa9   : > { %1794 = vmatpush1.msk.msra.mxu0 %vm190_vm1, %v1009_v44 }
  0xab   : > { %v1172_v46 = vpop.permute.xlu1 %1171  ;;  %1795 = vmatmul.mubr.msk.f32.vlgmr.msra.gmra.mxu0 %vm186_vm2, %v1792_v40  ;;  %v1176_v47 = vpop.permute.xlu0 %1175 }
  0xac   : > { %v1178_v48 = vsel %vm1177_vm8, %v1172_v46, %v1174_v42  ;;  %v1179_v49 = vsel %vm1177_vm8, %v1174_v42, %v1176_v47  ;;  %1868 = vmatpush3.msk.msra.mxu1 %vm190_vm1, %v1176_v47  ;;  %1253 = vmatprep.mubr.f32.mxu0 %v1999_v0 }
  0xad   : > { %1799 = vmatprep.subr.msk.mxu0 %vm190_vm1, %v1179_v49  ;;  %1870 = vmatmul.mubr.msk.f32.vlgmr.msra.gmra.mxu1 %vm186_vm2, %v1798_v45 }
  0xae   : > { %1800 = vmatpush1.msk.msra.mxu0 %vm190_vm1, %v1178_v48  ;;  %1872 = vmatprep.subr.mxu1 %v1999_v0 }
  0xaf   : > { %v1345_v51 = vpop.permute.xlu1 %1344  ;;  %1801 = vmatmul.mubr.msk.f32.vlgmr.msra.gmra.mxu0 %vm186_vm2, %v1798_v45  ;;  %v1343_v52 = vpop.permute.xlu0 %1342  ;;  %1874 = vmatprep.mubr.msk.f32.mxu1 %vm2000_vm0, %v1999_v0 }
  0xb0   : > { %v1348_v53 = vsel %vm1346_vm9, %v1343_v52, %v1345_v51  ;;  %1873 = vmatpush3.msk.msra.mxu1 %vm190_vm1, %v1345_v51  ;;  %1422 = vmatprep.mubr.f32.mxu0 %v1999_v0 }
  0xb1   : > { %1805 = vmatprep.subr.msk.mxu0 %vm190_vm1, %v1348_v53  ;;  %1875 = vmatmul.mubr.msk.f32.vlgmr.msra.gmra.mxu1 %vm186_vm2, %v1804_v50 }
  0xb2   : > { %1877 = vmatprep.subr.mxu1 %v1999_v0  ;;  %1879 = vmatprep.mubr.msk.f32.mxu1 %vm2000_vm0, %v1999_v0 }
  0xb3   : > { %v1512_v54 = vpop.permute.xlu1 %1511  ;;  %v1341_v55 = vpop.permute.xlu0 %1340 }
  0xb4   : > { %v1347_v56 = vsel %vm1346_vm9, %v1341_v55, %v1343_v52 }
  0xb5   : > { %1806 = vmatpush1.msk.msra.mxu0 %vm190_vm1, %v1347_v56 }
  0xb6   : > { %1807 = vmatmul.mubr.msk.f32.vlgmr.msra.gmra.mxu0 %vm186_vm2, %v1804_v50 }
  0xb7   : > { %v1510_v58 = vpop.permute.xlu1 %1509  ;;  %v1514_v59 = vpop.permute.xlu0 %1513  ;;  %1591 = vmatprep.mubr.f32.mxu0 %v1999_v0 }
  0xb8   : > { %v1516_v60 = vsel %vm1515_vm10, %v1510_v58, %v1512_v54  ;;  %v1517_v61 = vsel %vm1515_vm10, %v1512_v54, %v1514_v59  ;;  %1878 = vmatpush3.msk.msra.mxu1 %vm190_vm1, %v1514_v59 }
  0xb9   : > { %1811 = vmatprep.subr.msk.mxu0 %vm190_vm1, %v1517_v61  ;;  %1880 = vmatmul.mubr.msk.f32.vlgmr.msra.gmra.mxu1 %vm186_vm2, %v1810_v57 }
  0xba   : > { %1812 = vmatpush1.msk.msra.mxu0 %vm190_vm1, %v1516_v60 }
  0xbb   : > { %1813 = vmatmul.mubr.msk.f32.vlgmr.msra.gmra.mxu0 %vm186_vm2, %v1810_v57 }
  0xc4   : > { %v1675_v49 = vpop.permute.xlu0 %1674 }
 0x14d   : > { %v334_v62 = vpop.f32.mrf.mxu1 }
 0x14f   : > { %v1841_v63 = vpop.f32.mrf.mxu1 }
 0x151   : > { %v484_v1 = vpop.f32.mrf.mxu1 }
 0x152   : > { %v485_v14 = vadd.f32 %v484_v1, %v334_v62 }
 0x153   : > { %v1846_v2 = vpop.f32.mrf.mxu1 }
 0x155   : > { %v650_v3 = vpop.f32.mrf.mxu1 }
 0x156   : > { %v656_v19 = vadd.f32 %v650_v3, %v485_v14 }
 0x157   : > { %v263_v4 = vpop.f32.mrf.mxu0  ;;  %v1851_v5 = vpop.f32.mrf.mxu1 }
 0x159   : > { %v265_v0 = vpop.f32.mrf.mxu0 }
 0x15a   : > { %v819_v6 = vpop.f32.mrf.mxu1 }
 0x15b   : > { %v413_v7 = vpop.f32.mrf.mxu0  ;;  %v825_v23 = vadd.f32 %v819_v6, %v656_v19 }
 0x15c   : > { %v1856_v8 = vpop.f32.mrf.mxu1  ;;  %v414_v26 = vadd.f32 %v413_v7, %v263_v4 }
 0x15d   : > { %v415_v9 = vpop.f32.mrf.mxu0 }
 0x15e   : > { %v416_v28 = vadd.f32 %v415_v9, %v265_v0 }
 0x15f   : > { %v579_v10 = vpop.f32.mrf.mxu0 }
 0x160   : > { %v654_v29 = vadd.f32 %v579_v10, %v414_v26 }
 0x161   : > { %v581_v11 = vpop.f32.mrf.mxu0 }
 0x162   : > { %v988_v12 = vpop.f32.mrf.mxu1  ;;  %v655_v33 = vadd.f32 %v581_v11, %v416_v28 }
 0x163   : > { %v748_v13 = vpop.f32.mrf.mxu0  ;;  %v994_v30 = vadd.f32 %v988_v12, %v825_v23 }
 0x164   : > { %v1861_v15 = vpop.f32.mrf.mxu1  ;;  %v823_v34 = vadd.f32 %v748_v13, %v654_v29 }
 0x165   : > { %v750_v16 = vpop.f32.mrf.mxu0 }
 0x166   : > { %v1157_v17 = vpop.f32.mrf.mxu1  ;;  %v824_v36 = vadd.f32 %v750_v16, %v655_v33 }
 0x167   : > { %v917_v18 = vpop.f32.mrf.mxu0  ;;  %v1163_v38 = vadd.f32 %v1157_v17, %v994_v30 }
 0x168   : > { %v1866_v20 = vpop.f32.mrf.mxu1  ;;  %v992_v37 = vadd.f32 %v917_v18, %v823_v34 }
 0x169   : > { %v919_v21 = vpop.f32.mrf.mxu0 }
 0x16a   : > { %v993_v40 = vadd.f32 %v919_v21, %v824_v36 }
 0x16b   : > { %v1086_v22 = vpop.f32.mrf.mxu0 }
 0x16c   : > { %v1161_v41 = vadd.f32 %v1086_v22, %v992_v37 }
 0x16d   : > { %v1088_v24 = vpop.f32.mrf.mxu0  ;;  %v1326_v25 = vpop.f32.mrf.mxu1 }
 0x16e   : > { %v1332_v42 = vadd.f32 %v1326_v25, %v1163_v38  ;;  %v1162_v44 = vadd.f32 %v1088_v24, %v993_v40 }
 0x16f   : > { %v1871_v27 = vpop.f32.mrf.mxu1  ;;  %v1255_v31 = vpop.f32.mrf.mxu0 }
 0x170   : > { %v1330_v45 = vadd.f32 %v1255_v31, %v1161_v41 }
 0x171   : > { %v1495_v32 = vpop.f32.mrf.mxu1  ;;  %v1257_v39 = vpop.f32.mrf.mxu0 }
 0x172   : > { %v1501_v46 = vadd.f32 %v1495_v32, %v1332_v42  ;;  %v1331_v50 = vadd.f32 %v1257_v39, %v1162_v44 }
 0x173   : > { %v1876_v35 = vpop.f32.mrf.mxu1 }
 0x176   : > { %v1424_v43 = vpop.f32.mrf.mxu0 }
 0x177   : > { %v1499_v51 = vadd.f32 %v1424_v43, %v1330_v45 }
 0x178   : > { %v1426_v47 = vpop.f32.mrf.mxu0 }
 0x179   : > { %v1664_v48 = vpop.f32.mrf.mxu1  ;;  %v1500_v55 = vadd.f32 %v1426_v47, %v1331_v50 }
 0x17a   : > { %v1670_v52 = vadd.f32 %v1664_v48, %v1501_v46 }
 0x17b   : > { %v1593_v53 = vpop.f32.mrf.mxu0  ;;  %v1881_v54 = vpop.f32.mrf.mxu1 }
 0x17c   : > { %v1668_v56 = vadd.f32 %v1593_v53, %v1499_v51  ;;  %v1679_v57 = vadd.f32 %v1675_v49, %v1670_v52 }
 0x17d   : > { %v1595_v58 = vpop.f32.mrf.mxu0 }
 0x17e   : > { %v1677_v59 = vadd.f32 %v1675_v49, %v1668_v56  ;;  %1683 = vst.msk [vmem:[%s163_s24 + $0x10] sm:$0xff] %vm1682_vm11, %v1679_v57  ;;  %v1669_v60 = vadd.f32 %v1595_v58, %v1500_v55 }
 0x180   : > { %1680 = vst [vmem:[%s163_s24] sm:$0xff] %v1677_v59  ;;  %v1678_v61 = vadd.f32 %v1675_v49, %v1669_v60 }
 0x182   : > { %1681 = vst [vmem:[%s163_s24 + $0x8] sm:$0xff] %v1678_v61 }
 0x183   : > { %1950 = shalt.err (!%p1947_p3)
}
 0x184   : > { %s1951_s6 = scalar_lea.hbm %s1697_s28, 384  ;;  %s1955_s9 = scalar_lea.hbm %s2277_s3, 768 }
 0x185   : > { %p1952_p4 = scmp.ne.s32.totalorder %s1697_s28, %s1951_s6  ;;  %p1956_p9 = scmp.lt.s32.totalorder %s1697_s28, %s2277_s3 }
 0x186   : > { %p1957_p10 = scmp.lt.s32.totalorder %s1955_s9, %s1951_s6 }
 0x187   : > { %p1953_p7 = pnand %p1952_p4, %p2069_p5 }
 0x188   : > { %p1958_p11 = por %p1957_p10, %p1956_p9 }
 0x189   : > { %p1954_p8 = pneg %p1953_p7 }
 0x18b   : > { %p1959_p12 = pnand %p1958_p11, %p1954_p8 }
 0x18d   : > { %1962 = shalt.err (!%p1959_p12)
}
 0x18e   : > { %1885 = dma.vmem_to_hbm [thread:$0]  (%p2069_p5), %s1700_s25, 384, %s1697_s28, %s1685_s29  }
 0x18f PF: > { %p1891_p13 = scmp.ge.s32.totalorder %s1997_s15, 2  ;;  %s1711_s17 = sand.u32 1, %s1985_s12  }
 0x190   : > { %s1712_s19 = scalar_lea.sflag [#allocation3], %s1711_s17 }
 0x191   : > { %p1888_p0 = pnand %p1891_p13, %p2073_p6 }
 0x193   : > { %p1889_p1 = pneg %p1888_p0 }
 0x195   : > { %1980 = dma.done.wait (%p1889_p1), %s1712_s19, 384  }
 0x196   : > { %1982 = vsyncadd (%p1889_p1), %s1712_s19, 4294966912  ;;  %p13_p2 = scmp.ge.s32.totalorder %s2056_s18, 4   ;;  %s2280_s12 = smov %s1989_s13 }
 0x197   : > { %s2281_s13 = smov %s1993_s14  ;;  %s2282_s14 = smov %s2067_s21 }
 0x198   : > { %s2283_s15 = smov %s2056_s18  ;;  %15 = sbr.rel (!%p13_p2) target bundleno = 3 (0x3), region = 75 }
 0x19d   :  { %1717 = vsyncpa [#allocation3], 1 }
 0x19e   :  { %1719 = vsyncpa [#allocation3 + $0x1], 1 }

</bundles_post_ra>
